<compile_context>
chip_gen: v7x
topology: tpu7x:2x2x1
jax: 0.10.0
libtpu: 0.0.40
codegen_flags: <defaults>
</compile_context>

<pallas_src>
import math
import jax
import jax.numpy as jnp
from jax.experimental import pallas as pl
from jax.experimental.pallas import tpu as pltpu

# ---------------- config (small, consistent with the module) ----------------
B = 2            # batch
S = 8            # sequence length
H = 32           # hidden_size
NH = 4           # num_attention_heads
D = H // NH      # attention_head_size
I = 64           # intermediate_size
LN_EPS = 1e-12
NEG_BIG = -1e9   # cross-head blocking value (exp underflows to exactly 0)

# tight bf16 weight-slab column offsets (total width 256)
QKV_OFF = 0                  # (H, 3H) fused query/key/value weight
AD_OFF = 3 * H               # (H, H)  attention_dense weight          -> 96
WI_OFF = AD_OFF + H          # (H, I)  interm_dense weight             -> 128
WO_T_OFF = WI_OFF + I        # (H, H)  out_dense weight rows 0:32      -> 192
WO_B_OFF = WO_T_OFF + H      # (H, H)  out_dense weight rows 32:64     -> 224
W_ROWS = H                   # 32
W_COLS = WO_B_OFF + H        # 256

# bias/LayerNorm slab rows (shape (8, 128) f32, one vreg)
R_BQKV, R_BAD, R_G1, R_BE1, R_BI, R_BO, R_G2, R_BE2 = range(8)


def _erf_poly(x):
    """Abramowitz & Stegun 7.1.26 erf approximation (|err| < 1.5e-7).

    Uses only exp / mul / add / where, so it never depends on an erf lowering
    inside Mosaic; exp runs on the EUP slot.
    """
    a1, a2, a3, a4, a5 = 0.254829592, -0.284496736, 1.421413741, -1.453152027, 1.061405429
    p = 0.3275911
    sgn = jnp.where(x >= 0.0, 1.0, -1.0)
    ax = jnp.abs(x)
    t = 1.0 / (1.0 + p * ax)
    poly = ((((a5 * t + a4) * t + a3) * t + a2) * t + a1) * t
    return sgn * (1.0 - poly * jnp.exp(-ax * ax))


def _gelu_exact(x):
    """torch.nn.functional.gelu default (erf-based), in f32."""
    return 0.5 * x * (1.0 + _erf_poly(x * (1.0 / math.sqrt(2.0))))


def bert_layer_kernel(x_ref, mask_ref, w_ref, b_ref, o_ref):
    # x_ref:    (S, H)          f32   one batch's tokens
    # mask_ref: (NH*S, NH*S)    f32   0 / -10000 (key masked) / NEG_BIG (cross-head)
    # w_ref:    (32, 256)       bf16  tight weight slab
    # b_ref:    (8, 128)        f32   biases + LayerNorm params
    x = x_ref[...]                                   # (S, H) f32
    xb = x.astype(jnp.bfloat16)

    # ---- fused QKV projection: ONE MXU matmul (H -> 3H), f32 accumulate ----
    wqkv = w_ref[:, QKV_OFF:QKV_OFF + 3 * H]                         # (H, 3H) bf16
    qkv = (jnp.dot(xb, wqkv, preferred_element_type=jnp.float32)
           + b_ref[R_BQKV:R_BQKV + 1, 0:3 * H])                      # (S, 3H) f32

    # ---- head-major flattening: (S, H) -> (NH*S, D) via static slices + sublane concat
    def split_heads(off):
        return jnp.concatenate(
            [qkv[:, off + h * D:off + (h + 1) * D] for h in range(NH)], axis=0)

    q2 = split_heads(0 * H).astype(jnp.bfloat16)     # (NH*S, D)
    k2 = split_heads(1 * H).astype(jnp.bfloat16)
    v2 = split_heads(2 * H).astype(jnp.bfloat16)

    # ---- flattened 2-D attention: one 32-wide scores matmul ----
    scores = jax.lax.dot_general(
        q2, k2, (((1,), (1,)), ((), ())),
        preferred_element_type=jnp.float32) * (1.0 / math.sqrt(D))   # (NH*S, NH*S) f32

    # masked_fill semantics + cross-head blocking in a single where:
    # mask values: 0 -> keep score, -10000 -> fill with -10000, NEG_BIG -> exclude.
    fill = mask_ref[...]
    scores = jnp.where(fill < -0.5, fill, scores)

    # softmax over keys (f32); denominator reciprocal on the EUP slot
    m = jnp.max(scores, axis=-1, keepdims=True)
    e = jnp.exp(scores - m)
    probs = e * pl.reciprocal(jnp.sum(e, axis=-1, keepdims=True), approx=True)

    ctx = jnp.dot(probs.astype(jnp.bfloat16), v2,
                  preferred_element_type=jnp.float32)                # (NH*S, D) f32
    # reassemble == torch.cat over heads: (S, H) with column index h*D + d
    atten = jnp.concatenate(
        [ctx[h * S:(h + 1) * S, :] for h in range(NH)], axis=1)      # (S, H) f32

    # ---- add & norm #1: LN(x + attention_dense(atten)) ----
    wad = w_ref[:, AD_OFF:AD_OFF + H]
    y = (x
         + jnp.dot(atten.astype(jnp.bfloat16), wad, preferred_element_type=jnp.float32)
         + b_ref[R_BAD:R_BAD + 1, 0:H])
    mu = jnp.mean(y, axis=-1, keepdims=True)
    var = jnp.mean((y - mu) ** 2, axis=-1, keepdims=True)
    normed = ((y - mu) * jax.lax.rsqrt(var + LN_EPS)
              * b_ref[R_G1:R_G1 + 1, 0:H] + b_ref[R_BE1:R_BE1 + 1, 0:H])

    # ---- feed-forward: gelu(interm_dense(normed)) (exact erf, torch default) ----
    wi = w_ref[:, WI_OFF:WI_OFF + I]
    interm = (jnp.dot(normed.astype(jnp.bfloat16), wi, preferred_element_type=jnp.float32)
              + b_ref[R_BI:R_BI + 1, 0:I])
    interm = _gelu_exact(interm)

    # ---- out_dense with split WO halves (no in-kernel concat of WO) ----
    ib = interm.astype(jnp.bfloat16)
    wo_t = w_ref[:, WO_T_OFF:WO_T_OFF + H]           # rows 0:32 of (I, H) weight
    wo_b = w_ref[:, WO_B_OFF:WO_B_OFF + H]           # rows 32:64
    ffn = (jnp.dot(ib[:, 0:H], wo_t, preferred_element_type=jnp.float32)
           + jnp.dot(ib[:, H:I], wo_b, preferred_element_type=jnp.float32))

    # ---- add & norm #2: LN(normed + out_dense(interm)) ----
    y2 = normed + ffn + b_ref[R_BO:R_BO + 1, 0:H]
    mu2 = jnp.mean(y2, axis=-1, keepdims=True)
    var2 = jnp.mean((y2 - mu2) ** 2, axis=-1, keepdims=True)
    out = ((y2 - mu2) * jax.lax.rsqrt(var2 + LN_EPS)
           * b_ref[R_G2:R_G2 + 1, 0:H] + b_ref[R_BE2:R_BE2 + 1, 0:H])

    o_ref[...] = out.astype(o_ref.dtype)
    # TODO(synk): for a stacked (multi-layer / large-batch) BERT, keep the
    # weight slabs resident across calls (pl.ANY + one-time copy) and widen
    # the output lane dim; not worth it for this single 8-token-per-step toy.


def bert_layer(x, attention_mask, w_slab, b_slab):
    """x: (B, S, H) f32; attention_mask: (B, 1, 1, S), 0 = keep, <0 = masked."""
    attention_mask = attention_mask[:, :, :, :512]   # mimic the PyTorch slice (no-op here)

    # Precompute the (NH*S, NH*S) per-batch "fill" matrix (head-major rows/cols):
    #   same head & key unmasked -> 0        (keep score)
    #   same head & key masked   -> -10000   (masked_fill value)
    #   different head           -> NEG_BIG  (excluded from the flattened softmax)
    idx = jnp.arange(S * NH)
    same_head = (idx[:, None] // S) == (idx[None, :] // S)           # (NH*S, NH*S)
    key_pos = idx % S                                                # (NH*S,)
    km = attention_mask[:, 0, 0, :]                                  # (B, S)
    key_masked = km[:, key_pos] < 0                                  # (B, NH*S)
    fill = jnp.where(same_head[None, :, :],
                     jnp.where(key_masked[:, None, :], -10000.0, 0.0),
                     NEG_BIG).astype(jnp.float32)                    # (B, NH*S, NH*S)

    out = pl.pallas_call(
        bert_layer_kernel,
        out_shape=jax.ShapeDtypeStruct((B, S, H), jnp.float32),
        grid=(B,),
        in_specs=[
            pl.BlockSpec((None, S, H), lambda b: (b, 0, 0)),                 # x
            pl.BlockSpec((None, S * NH, S * NH), lambda b: (b, 0, 0)),       # fill mask
            pl.BlockSpec((W_ROWS, W_COLS), lambda b: (0, 0)),                # weights (bf16)
            pl.BlockSpec((8, 128), lambda b: (0, 0)),                        # biases / LN
        ],
        out_specs=pl.BlockSpec((None, S, H), lambda b: (b, 0, 0)),
        compiler_params=pltpu.CompilerParams(
            dimension_semantics=("parallel",)),
    )(x, fill, w_slab, b_slab)
    return out


def init_params(key):
    """Deterministic synthetic parameters. Linear weights stored transposed (in, out)."""
    ks = jax.random.split(key, 8)
    scale = 0.02
    return {
        'wq': jax.random.normal(ks[0], (H, H), jnp.float32) * scale,
        'bq': jnp.zeros((1, H), jnp.float32) + 0.01,
        'wk': jax.random.normal(ks[1], (H, H), jnp.float32) * scale,
        'bk': jnp.zeros((1, H), jnp.float32) - 0.01,
        'wv': jax.random.normal(ks[2], (H, H), jnp.float32) * scale,
        'bv': jnp.zeros((1, H), jnp.float32) + 0.02,
        'wad': jax.random.normal(ks[3], (H, H), jnp.float32) * scale,
        'bad': jnp.zeros((1, H), jnp.float32),
        'g1': jnp.ones((1, H), jnp.float32),
        'be1': jnp.zeros((1, H), jnp.float32),
        'wi': jax.random.normal(ks[4], (H, I), jnp.float32) * scale,
        'bi': jnp.zeros((1, I), jnp.float32) + 0.005,
        'wo': jax.random.normal(ks[5], (I, H), jnp.float32) * scale,
        'bo': jnp.zeros((1, H), jnp.float32),
        'g2': jnp.ones((1, H), jnp.float32),
        'be2': jnp.zeros((1, H), jnp.float32),
    }


def pack_params(p):
    """Pack all weights into one tight bf16 slab + one f32 bias/LN slab."""
    w = jnp.zeros((W_ROWS, W_COLS), jnp.float32)
    w = w.at[:, QKV_OFF:QKV_OFF + 3 * H].set(
        jnp.concatenate([p['wq'], p['wk'], p['wv']], axis=1))
    w = w.at[:, AD_OFF:AD_OFF + H].set(p['wad'])
    w = w.at[:, WI_OFF:WI_OFF + I].set(p['wi'])
    w = w.at[:, WO_T_OFF:WO_T_OFF + H].set(p['wo'][0:H, :])
    w = w.at[:, WO_B_OFF:WO_B_OFF + H].set(p['wo'][H:I, :])
    w = w.astype(jnp.bfloat16)

    b = jnp.zeros((8, 128), jnp.float32)
    b = b.at[R_BQKV:R_BQKV + 1, 0:3 * H].set(
        jnp.concatenate([p['bq'], p['bk'], p['bv']], axis=1))
    b = b.at[R_BAD:R_BAD + 1, 0:H].set(p['bad'])
    b = b.at[R_G1:R_G1 + 1, 0:H].set(p['g1'])
    b = b.at[R_BE1:R_BE1 + 1, 0:H].set(p['be1'])
    b = b.at[R_BI:R_BI + 1, 0:I].set(p['bi'])
    b = b.at[R_BO:R_BO + 1, 0:H].set(p['bo'])
    b = b.at[R_G2:R_G2 + 1, 0:H].set(p['g2'])
    b = b.at[R_BE2:R_BE2 + 1, 0:H].set(p['be2'])
    return w, b


def bert_layer_ref(x, attention_mask, p):
    """Pure-JAX f32 reference mirroring the PyTorch forward (eval mode)."""
    mask = attention_mask[:, :, :, :512]                        # (B,1,1,S)
    q = (x @ p['wq'] + p['bq']).reshape(B, S, NH, D).transpose(0, 2, 1, 3)
    k = (x @ p['wk'] + p['bk']).reshape(B, S, NH, D).transpose(0, 2, 1, 3)
    v = (x @ p['wv'] + p['bv']).reshape(B, S, NH, D).transpose(0, 2, 1, 3)
    scores = jnp.einsum('bhqd,bhkd->bhqk', q, k) / math.sqrt(D)
    scores = jnp.where(mask < 0, -10000.0, scores)              # masked_fill semantics
    probs = jax.nn.softmax(scores, axis=-1)
    per_head = jnp.einsum('bhqk,bhkd->bhqd', probs, v)
    atten = per_head.transpose(0, 2, 1, 3).reshape(B, S, H)

    def ln(y, g, bb):
        mu = y.mean(-1, keepdims=True)
        var = ((y - mu) ** 2).mean(-1, keepdims=True)
        return (y - mu) * jax.lax.rsqrt(var + LN_EPS) * g + bb

    normed = ln(x + (atten @ p['wad'] + p['bad']), p['g1'], p['be1'])
    interm = jax.nn.gelu(normed @ p['wi'] + p['bi'], approximate=False)
    return ln(normed + (interm @ p['wo'] + p['bo']), p['g2'], p['be2'])


if __name__ == "__main__":
    key = jax.random.PRNGKey(0)
    kx, kp = jax.random.split(key)
    x = jax.random.normal(kx, (B, S, H), jnp.float32)
    # additive-style mask: 0 = keep, -10000 = masked (last 2 key positions of batch 1)
    mask = jnp.zeros((B, 1, 1, S), jnp.float32)
    mask = mask.at[1, :, :, -2:].set(-10000.0)

    params = init_params(kp)
    w_slab, b_slab = pack_params(params)

    out = bert_layer(x, mask, w_slab, b_slab)
    out = jax.block_until_ready(out)
    assert out.shape == (B, S, H)

    # Primary check: reference using the same bf16-rounded weights the kernel
    # sees (isolates kernel numerics from the intended weight quantization).
    p_bf = dict(params)
    for name in ('wq', 'wk', 'wv', 'wad', 'wi', 'wo'):
        p_bf[name] = params[name].astype(jnp.bfloat16).astype(jnp.float32)
    ref_bf = bert_layer_ref(x, mask, p_bf)
    assert jnp.allclose(out, ref_bf, rtol=2e-3, atol=2e-3), "mismatch vs bf16-weight reference"

    # Secondary check: full-f32 reference (bounds the bf16 weight quantization effect).
    ref_f32 = bert_layer_ref(x, mask, params)
    assert jnp.allclose(out, ref_f32, rtol=1e-2, atol=1e-2), "mismatch vs f32 reference"

    print("KERNEL_OK")
</pallas_src>

<mosaic_0001>
module attributes {stable_mosaic.version = 11 : i64} {
  func.func @bert_layer_kernel(%arg0: i32, %arg1: memref<1x8x32xf32, #tpu.memory_space<vmem>>, %arg2: memref<1x32x32xf32, #tpu.memory_space<vmem>>, %arg3: memref<32x256xbf16, #tpu.memory_space<vmem>>, %arg4: memref<8x128xf32, #tpu.memory_space<vmem>>, %arg5: memref<1x8x32xf32, #tpu.memory_space<vmem>>) attributes {dimension_semantics = [#tpu.dimension_semantics<parallel>], iteration_bounds = array<i64: 2>, scalar_prefetch = 0 : i64, scratch_operands = 0 : i64, tpu.core_type = #tpu.core_type<tc>, window_params = [{transform_indices = @transform_0, window_bounds = array<i64: 1, 8, 32>}, {transform_indices = @transform_1, window_bounds = array<i64: 1, 32, 32>}, {pipeline_mode = #tpu.pipeline_mode<synchronous>, transform_indices = @transform_2, window_bounds = array<i64: 32, 256>}, {pipeline_mode = #tpu.pipeline_mode<synchronous>, transform_indices = @transform_3, window_bounds = array<i64: 8, 128>}, {transform_indices = @transform_4, window_bounds = array<i64: 1, 8, 32>}]} {
    %c0 = arith.constant 0 : index
    %c0_0 = arith.constant 0 : index
    %c0_1 = arith.constant 0 : index
    %0 = vector.load %arg1[%c0, %c0_0, %c0_1] : memref<1x8x32xf32, #tpu.memory_space<vmem>>, vector<1x8x32xf32>
    %1 = vector.shape_cast %0 : vector<1x8x32xf32> to vector<8x32xf32>
    %2 = arith.truncf %1 : vector<8x32xf32> to vector<8x32xbf16>
    %c0_2 = arith.constant 0 : index
    %c0_3 = arith.constant 0 : index
    %3 = vector.load %arg3[%c0_2, %c0_3] : memref<32x256xbf16, #tpu.memory_space<vmem>>, vector<32x96xbf16>
    %cst = arith.constant dense<0.000000e+00> : vector<8x96xf32>
    %4 = tpu.matmul %2, %3, %cst {dimension_numbers = #tpu.dot_dimension_numbers<[1], [0], [0], [1], [0, 0, 1, 1], [], []>} : vector<8x32xbf16>, vector<32x96xbf16>, vector<8x96xf32> -> vector<8x96xf32>
    %c0_4 = arith.constant 0 : index
    %c0_5 = arith.constant 0 : index
    %5 = vector.load %arg4[%c0_4, %c0_5] : memref<8x128xf32, #tpu.memory_space<vmem>>, vector<1x96xf32>
    %6 = vector.broadcast %5 : vector<1x96xf32> to vector<8x96xf32>
    %7 = arith.addf %4, %6 : vector<8x96xf32>
    %8 = vector.extract_strided_slice %7 {offsets = [0, 0], sizes = [8, 8], strides = [1, 1]} : vector<8x96xf32> to vector<8x8xf32>
    %9 = vector.extract_strided_slice %7 {offsets = [0, 8], sizes = [8, 8], strides = [1, 1]} : vector<8x96xf32> to vector<8x8xf32>
    %10 = vector.extract_strided_slice %7 {offsets = [0, 16], sizes = [8, 8], strides = [1, 1]} : vector<8x96xf32> to vector<8x8xf32>
    %11 = vector.extract_strided_slice %7 {offsets = [0, 24], sizes = [8, 8], strides = [1, 1]} : vector<8x96xf32> to vector<8x8xf32>
    %12 = tpu.concatenate %8, %9, %10, %11 in 0 : vector<8x8xf32>, vector<8x8xf32>, vector<8x8xf32>, vector<8x8xf32> -> vector<32x8xf32>
    %13 = arith.truncf %12 : vector<32x8xf32> to vector<32x8xbf16>
    %14 = vector.extract_strided_slice %7 {offsets = [0, 32], sizes = [8, 8], strides = [1, 1]} : vector<8x96xf32> to vector<8x8xf32>
    %15 = vector.extract_strided_slice %7 {offsets = [0, 40], sizes = [8, 8], strides = [1, 1]} : vector<8x96xf32> to vector<8x8xf32>
    %16 = vector.extract_strided_slice %7 {offsets = [0, 48], sizes = [8, 8], strides = [1, 1]} : vector<8x96xf32> to vector<8x8xf32>
    %17 = vector.extract_strided_slice %7 {offsets = [0, 56], sizes = [8, 8], strides = [1, 1]} : vector<8x96xf32> to vector<8x8xf32>
    %18 = tpu.concatenate %14, %15, %16, %17 in 0 : vector<8x8xf32>, vector<8x8xf32>, vector<8x8xf32>, vector<8x8xf32> -> vector<32x8xf32>
    %19 = arith.truncf %18 : vector<32x8xf32> to vector<32x8xbf16>
    %20 = vector.extract_strided_slice %7 {offsets = [0, 64], sizes = [8, 8], strides = [1, 1]} : vector<8x96xf32> to vector<8x8xf32>
    %21 = vector.extract_strided_slice %7 {offsets = [0, 72], sizes = [8, 8], strides = [1, 1]} : vector<8x96xf32> to vector<8x8xf32>
    %22 = vector.extract_strided_slice %7 {offsets = [0, 80], sizes = [8, 8], strides = [1, 1]} : vector<8x96xf32> to vector<8x8xf32>
    %23 = vector.extract_strided_slice %7 {offsets = [0, 88], sizes = [8, 8], strides = [1, 1]} : vector<8x96xf32> to vector<8x8xf32>
    %24 = tpu.concatenate %20, %21, %22, %23 in 0 : vector<8x8xf32>, vector<8x8xf32>, vector<8x8xf32>, vector<8x8xf32> -> vector<32x8xf32>
    %25 = arith.truncf %24 : vector<32x8xf32> to vector<32x8xbf16>
    %cst_6 = arith.constant dense<0.000000e+00> : vector<32x32xf32>
    %26 = tpu.matmul %13, %19, %cst_6 {dimension_numbers = #tpu.dot_dimension_numbers<[1], [1], [0], [0], [0, 0, 1, 0], [], []>} : vector<32x8xbf16>, vector<32x8xbf16>, vector<32x32xf32> -> vector<32x32xf32>
    %cst_7 = arith.constant 0.353553385 : f32
    %27 = vector.broadcast %cst_7 : f32 to vector<32x32xf32>
    %28 = arith.mulf %26, %27 : vector<32x32xf32>
    %c0_8 = arith.constant 0 : index
    %c0_9 = arith.constant 0 : index
    %c0_10 = arith.constant 0 : index
    %29 = vector.load %arg2[%c0_8, %c0_9, %c0_10] : memref<1x32x32xf32, #tpu.memory_space<vmem>>, vector<1x32x32xf32>
    %30 = vector.shape_cast %29 : vector<1x32x32xf32> to vector<32x32xf32>
    %cst_11 = arith.constant -5.000000e-01 : f32
    %31 = vector.broadcast %cst_11 : f32 to vector<32x32xf32>
    %32 = arith.cmpf olt, %30, %31 : vector<32x32xf32>
    %33 = arith.select %32, %30, %28 : vector<32x32xi1>, vector<32x32xf32>
    %cst_12 = arith.constant dense<0xFF800000> : vector<32xf32>
    %34 = vector.multi_reduction <maximumf>, %33, %cst_12 [1] : vector<32x32xf32> to vector<32xf32>
    %35 = vector.shape_cast %34 : vector<32xf32> to vector<32x1xf32>
    %36 = vector.broadcast %35 : vector<32x1xf32> to vector<32x32xf32>
    %37 = arith.subf %33, %36 : vector<32x32xf32>
    %38 = math.exp %37 : vector<32x32xf32>
    %cst_13 = arith.constant dense<0.000000e+00> : vector<32xf32>
    %39 = vector.multi_reduction <add>, %38, %cst_13 [1] : vector<32x32xf32> to vector<32xf32>
    %40 = vector.shape_cast %39 : vector<32xf32> to vector<32x1xf32>
    %41 = tpu.reciprocal %40 {approx = true} : vector<32x1xf32> -> vector<32x1xf32>
    %42 = vector.broadcast %41 : vector<32x1xf32> to vector<32x32xf32>
    %43 = arith.mulf %38, %42 : vector<32x32xf32>
    %44 = arith.truncf %43 : vector<32x32xf32> to vector<32x32xbf16>
    %cst_14 = arith.constant dense<0.000000e+00> : vector<32x8xf32>
    %45 = tpu.matmul %44, %25, %cst_14 {dimension_numbers = #tpu.dot_dimension_numbers<[1], [0], [0], [1], [0, 0, 1, 1], [], []>} : vector<32x32xbf16>, vector<32x8xbf16>, vector<32x8xf32> -> vector<32x8xf32>
    %46 = vector.extract_strided_slice %45 {offsets = [0, 0], sizes = [8, 8], strides = [1, 1]} : vector<32x8xf32> to vector<8x8xf32>
    %47 = vector.extract_strided_slice %45 {offsets = [8, 0], sizes = [8, 8], strides = [1, 1]} : vector<32x8xf32> to vector<8x8xf32>
    %48 = vector.extract_strided_slice %45 {offsets = [16, 0], sizes = [8, 8], strides = [1, 1]} : vector<32x8xf32> to vector<8x8xf32>
    %49 = vector.extract_strided_slice %45 {offsets = [24, 0], sizes = [8, 8], strides = [1, 1]} : vector<32x8xf32> to vector<8x8xf32>
    %50 = tpu.concatenate %46, %47, %48, %49 in 1 : vector<8x8xf32>, vector<8x8xf32>, vector<8x8xf32>, vector<8x8xf32> -> vector<8x32xf32>
    %c0_15 = arith.constant 0 : index
    %c96 = arith.constant 96 : index
    %51 = vector.load %arg3[%c0_15, %c96] : memref<32x256xbf16, #tpu.memory_space<vmem>>, vector<32x32xbf16>
    %52 = arith.truncf %50 : vector<8x32xf32> to vector<8x32xbf16>
    %cst_16 = arith.constant dense<0.000000e+00> : vector<8x32xf32>
    %53 = tpu.matmul %52, %51, %cst_16 {dimension_numbers = #tpu.dot_dimension_numbers<[1], [0], [0], [1], [0, 0, 1, 1], [], []>} : vector<8x32xbf16>, vector<32x32xbf16>, vector<8x32xf32> -> vector<8x32xf32>
    %54 = arith.addf %1, %53 : vector<8x32xf32>
    %c1 = arith.constant 1 : index
    %c0_17 = arith.constant 0 : index
    %55 = vector.load %arg4[%c1, %c0_17] : memref<8x128xf32, #tpu.memory_space<vmem>>, vector<1x32xf32>
    %56 = vector.broadcast %55 : vector<1x32xf32> to vector<8x32xf32>
    %57 = arith.addf %54, %56 : vector<8x32xf32>
    %cst_18 = arith.constant dense<0.000000e+00> : vector<8xf32>
    %58 = vector.multi_reduction <add>, %57, %cst_18 [1] : vector<8x32xf32> to vector<8xf32>
    %59 = vector.shape_cast %58 : vector<8xf32> to vector<8x1xf32>
    %cst_19 = arith.constant 3.200000e+01 : f32
    %60 = vector.broadcast %cst_19 : f32 to vector<8x1xf32>
    %61 = arith.divf %59, %60 : vector<8x1xf32>
    %62 = vector.broadcast %61 : vector<8x1xf32> to vector<8x32xf32>
    %63 = arith.subf %57, %62 : vector<8x32xf32>
    %64 = arith.mulf %63, %63 : vector<8x32xf32>
    %cst_20 = arith.constant dense<0.000000e+00> : vector<8xf32>
    %65 = vector.multi_reduction <add>, %64, %cst_20 [1] : vector<8x32xf32> to vector<8xf32>
    %66 = vector.shape_cast %65 : vector<8xf32> to vector<8x1xf32>
    %cst_21 = arith.constant 3.200000e+01 : f32
    %67 = vector.broadcast %cst_21 : f32 to vector<8x1xf32>
    %68 = arith.divf %66, %67 : vector<8x1xf32>
    %69 = vector.broadcast %61 : vector<8x1xf32> to vector<8x32xf32>
    %70 = arith.subf %57, %69 : vector<8x32xf32>
    %cst_22 = arith.constant 9.99999996E-13 : f32
    %71 = vector.broadcast %cst_22 : f32 to vector<8x1xf32>
    %72 = arith.addf %68, %71 : vector<8x1xf32>
    %73 = math.rsqrt %72 : vector<8x1xf32>
    %74 = vector.broadcast %73 : vector<8x1xf32> to vector<8x32xf32>
    %75 = arith.mulf %70, %74 : vector<8x32xf32>
    %c2 = arith.constant 2 : index
    %c0_23 = arith.constant 0 : index
    %76 = vector.load %arg4[%c2, %c0_23] : memref<8x128xf32, #tpu.memory_space<vmem>>, vector<1x32xf32>
    %77 = vector.broadcast %76 : vector<1x32xf32> to vector<8x32xf32>
    %78 = arith.mulf %75, %77 : vector<8x32xf32>
    %c3 = arith.constant 3 : index
    %c0_24 = arith.constant 0 : index
    %79 = vector.load %arg4[%c3, %c0_24] : memref<8x128xf32, #tpu.memory_space<vmem>>, vector<1x32xf32>
    %80 = vector.broadcast %79 : vector<1x32xf32> to vector<8x32xf32>
    %81 = arith.addf %78, %80 : vector<8x32xf32>
    %c0_25 = arith.constant 0 : index
    %c128 = arith.constant 128 : index
    %82 = vector.load %arg3[%c0_25, %c128] : memref<32x256xbf16, #tpu.memory_space<vmem>>, vector<32x64xbf16>
    %83 = arith.truncf %81 : vector<8x32xf32> to vector<8x32xbf16>
    %cst_26 = arith.constant dense<0.000000e+00> : vector<8x64xf32>
    %84 = tpu.matmul %83, %82, %cst_26 {dimension_numbers = #tpu.dot_dimension_numbers<[1], [0], [0], [1], [0, 0, 1, 1], [], []>} : vector<8x32xbf16>, vector<32x64xbf16>, vector<8x64xf32> -> vector<8x64xf32>
    %c4 = arith.constant 4 : index
    %c0_27 = arith.constant 0 : index
    %85 = vector.load %arg4[%c4, %c0_27] : memref<8x128xf32, #tpu.memory_space<vmem>>, vector<1x64xf32>
    %86 = vector.broadcast %85 : vector<1x64xf32> to vector<8x64xf32>
    %87 = arith.addf %84, %86 : vector<8x64xf32>
    %cst_28 = arith.constant 5.000000e-01 : f32
    %88 = vector.broadcast %cst_28 : f32 to vector<8x64xf32>
    %89 = arith.mulf %88, %87 : vector<8x64xf32>
    %cst_29 = arith.constant 0.707106769 : f32
    %90 = vector.broadcast %cst_29 : f32 to vector<8x64xf32>
    %91 = arith.mulf %87, %90 : vector<8x64xf32>
    %cst_30 = arith.constant 0.000000e+00 : f32
    %92 = vector.broadcast %cst_30 : f32 to vector<8x64xf32>
    %93 = arith.cmpf oge, %91, %92 : vector<8x64xf32>
    %cst_31 = arith.constant 1.000000e+00 : f32
    %cst_32 = arith.constant -1.000000e+00 : f32
    %94 = vector.broadcast %cst_31 : f32 to vector<8x64xf32>
    %95 = vector.broadcast %cst_32 : f32 to vector<8x64xf32>
    %96 = arith.select %93, %94, %95 : vector<8x64xi1>, vector<8x64xf32>
    %97 = math.absf %91 : vector<8x64xf32>
    %cst_33 = arith.constant 0.327591091 : f32
    %98 = vector.broadcast %cst_33 : f32 to vector<8x64xf32>
    %99 = arith.mulf %98, %97 : vector<8x64xf32>
    %cst_34 = arith.constant 1.000000e+00 : f32
    %100 = vector.broadcast %cst_34 : f32 to vector<8x64xf32>
    %101 = arith.addf %100, %99 : vector<8x64xf32>
    %cst_35 = arith.constant 1.000000e+00 : f32
    %102 = vector.broadcast %cst_35 : f32 to vector<8x64xf32>
    %103 = arith.divf %102, %101 : vector<8x64xf32>
    %cst_36 = arith.constant 1.06140542 : f32
    %104 = vector.broadcast %cst_36 : f32 to vector<8x64xf32>
    %105 = arith.mulf %104, %103 : vector<8x64xf32>
    %cst_37 = arith.constant -1.45315206 : f32
    %106 = vector.broadcast %cst_37 : f32 to vector<8x64xf32>
    %107 = arith.addf %105, %106 : vector<8x64xf32>
    %108 = arith.mulf %107, %103 : vector<8x64xf32>
    %cst_38 = arith.constant 1.42141378 : f32
    %109 = vector.broadcast %cst_38 : f32 to vector<8x64xf32>
    %110 = arith.addf %108, %109 : vector<8x64xf32>
    %111 = arith.mulf %110, %103 : vector<8x64xf32>
    %cst_39 = arith.constant -0.284496725 : f32
    %112 = vector.broadcast %cst_39 : f32 to vector<8x64xf32>
    %113 = arith.addf %111, %112 : vector<8x64xf32>
    %114 = arith.mulf %113, %103 : vector<8x64xf32>
    %cst_40 = arith.constant 0.254829586 : f32
    %115 = vector.broadcast %cst_40 : f32 to vector<8x64xf32>
    %116 = arith.addf %114, %115 : vector<8x64xf32>
    %117 = arith.mulf %116, %103 : vector<8x64xf32>
    %cst_41 = arith.constant 0.000000e+00 : f32
    %118 = vector.broadcast %cst_41 : f32 to vector<8x64xf32>
    %119 = arith.subf %118, %97 : vector<8x64xf32>
    %120 = arith.mulf %119, %97 : vector<8x64xf32>
    %121 = math.exp %120 : vector<8x64xf32>
    %122 = arith.mulf %117, %121 : vector<8x64xf32>
    %cst_42 = arith.constant 1.000000e+00 : f32
    %123 = vector.broadcast %cst_42 : f32 to vector<8x64xf32>
    %124 = arith.subf %123, %122 : vector<8x64xf32>
    %125 = arith.mulf %96, %124 : vector<8x64xf32>
    %cst_43 = arith.constant 1.000000e+00 : f32
    %126 = vector.broadcast %cst_43 : f32 to vector<8x64xf32>
    %127 = arith.addf %126, %125 : vector<8x64xf32>
    %128 = arith.mulf %89, %127 : vector<8x64xf32>
    %129 = arith.truncf %128 : vector<8x64xf32> to vector<8x64xbf16>
    %c0_44 = arith.constant 0 : index
    %c192 = arith.constant 192 : index
    %130 = vector.load %arg3[%c0_44, %c192] : memref<32x256xbf16, #tpu.memory_space<vmem>>, vector<32x32xbf16>
    %c0_45 = arith.constant 0 : index
    %c224 = arith.constant 224 : index
    %131 = vector.load %arg3[%c0_45, %c224] : memref<32x256xbf16, #tpu.memory_space<vmem>>, vector<32x32xbf16>
    %132 = vector.extract_strided_slice %129 {offsets = [0, 0], sizes = [8, 32], strides = [1, 1]} : vector<8x64xbf16> to vector<8x32xbf16>
    %cst_46 = arith.constant dense<0.000000e+00> : vector<8x32xf32>
    %133 = tpu.matmul %132, %130, %cst_46 {dimension_numbers = #tpu.dot_dimension_numbers<[1], [0], [0], [1], [0, 0, 1, 1], [], []>} : vector<8x32xbf16>, vector<32x32xbf16>, vector<8x32xf32> -> vector<8x32xf32>
    %134 = vector.extract_strided_slice %129 {offsets = [0, 32], sizes = [8, 32], strides = [1, 1]} : vector<8x64xbf16> to vector<8x32xbf16>
    %cst_47 = arith.constant dense<0.000000e+00> : vector<8x32xf32>
    %135 = tpu.matmul %134, %131, %cst_47 {dimension_numbers = #tpu.dot_dimension_numbers<[1], [0], [0], [1], [0, 0, 1, 1], [], []>} : vector<8x32xbf16>, vector<32x32xbf16>, vector<8x32xf32> -> vector<8x32xf32>
    %136 = arith.addf %133, %135 : vector<8x32xf32>
    %137 = arith.addf %81, %136 : vector<8x32xf32>
    %c5 = arith.constant 5 : index
    %c0_48 = arith.constant 0 : index
    %138 = vector.load %arg4[%c5, %c0_48] : memref<8x128xf32, #tpu.memory_space<vmem>>, vector<1x32xf32>
    %139 = vector.broadcast %138 : vector<1x32xf32> to vector<8x32xf32>
    %140 = arith.addf %137, %139 : vector<8x32xf32>
    %cst_49 = arith.constant dense<0.000000e+00> : vector<8xf32>
    %141 = vector.multi_reduction <add>, %140, %cst_49 [1] : vector<8x32xf32> to vector<8xf32>
    %142 = vector.shape_cast %141 : vector<8xf32> to vector<8x1xf32>
    %cst_50 = arith.constant 3.200000e+01 : f32
    %143 = vector.broadcast %cst_50 : f32 to vector<8x1xf32>
    %144 = arith.divf %142, %143 : vector<8x1xf32>
    %145 = vector.broadcast %144 : vector<8x1xf32> to vector<8x32xf32>
    %146 = arith.subf %140, %145 : vector<8x32xf32>
    %147 = arith.mulf %146, %146 : vector<8x32xf32>
    %cst_51 = arith.constant dense<0.000000e+00> : vector<8xf32>
    %148 = vector.multi_reduction <add>, %147, %cst_51 [1] : vector<8x32xf32> to vector<8xf32>
    %149 = vector.shape_cast %148 : vector<8xf32> to vector<8x1xf32>
    %cst_52 = arith.constant 3.200000e+01 : f32
    %150 = vector.broadcast %cst_52 : f32 to vector<8x1xf32>
    %151 = arith.divf %149, %150 : vector<8x1xf32>
    %152 = vector.broadcast %144 : vector<8x1xf32> to vector<8x32xf32>
    %153 = arith.subf %140, %152 : vector<8x32xf32>
    %cst_53 = arith.constant 9.99999996E-13 : f32
    %154 = vector.broadcast %cst_53 : f32 to vector<8x1xf32>
    %155 = arith.addf %151, %154 : vector<8x1xf32>
    %156 = math.rsqrt %155 : vector<8x1xf32>
    %157 = vector.broadcast %156 : vector<8x1xf32> to vector<8x32xf32>
    %158 = arith.mulf %153, %157 : vector<8x32xf32>
    %c6 = arith.constant 6 : index
    %c0_54 = arith.constant 0 : index
    %159 = vector.load %arg4[%c6, %c0_54] : memref<8x128xf32, #tpu.memory_space<vmem>>, vector<1x32xf32>
    %160 = vector.broadcast %159 : vector<1x32xf32> to vector<8x32xf32>
    %161 = arith.mulf %158, %160 : vector<8x32xf32>
    %c7 = arith.constant 7 : index
    %c0_55 = arith.constant 0 : index
    %162 = vector.load %arg4[%c7, %c0_55] : memref<8x128xf32, #tpu.memory_space<vmem>>, vector<1x32xf32>
    %163 = vector.broadcast %162 : vector<1x32xf32> to vector<8x32xf32>
    %164 = arith.addf %161, %163 : vector<8x32xf32>
    %c0_56 = arith.constant 0 : index
    %c0_57 = arith.constant 0 : index
    %c0_58 = arith.constant 0 : index
    %165 = vector.load %arg5[%c0_56, %c0_57, %c0_58] : memref<1x8x32xf32, #tpu.memory_space<vmem>>, vector<1x8x32xf32>
    %166 = vector.shape_cast %165 : vector<1x8x32xf32> to vector<8x32xf32>
    %167 = vector.shape_cast %164 : vector<8x32xf32> to vector<1x8x32xf32>
    tpu.vector_store %arg5[%c0_56, %c0_57, %c0_58], %167 {strides = array<i32>} : memref<1x8x32xf32, #tpu.memory_space<vmem>>, vector<1x8x32xf32>,
    return
  }
  func.func @transform_0(%arg0: i32) -> (i32, i32, i32) {
    %c0_i32 = arith.constant 0 : i32
    %c0_i32_0 = arith.constant 0 : i32
    %c0_i32_1 = arith.constant 0 : i32
    return %arg0, %c0_i32, %c0_i32_0 : i32, i32, i32
  }
  func.func @transform_1(%arg0: i32) -> (i32, i32, i32) {
    %c0_i32 = arith.constant 0 : i32
    %c0_i32_0 = arith.constant 0 : i32
    %c0_i32_1 = arith.constant 0 : i32
    return %arg0, %c0_i32, %c0_i32_0 : i32, i32, i32
  }
  func.func @transform_2(%arg0: i32) -> (i32, i32) {
    %c0_i32 = arith.constant 0 : i32
    %c0_i32_0 = arith.constant 0 : i32
    %c0_i32_1 = arith.constant 0 : i32
    return %c0_i32, %c0_i32_0 : i32, i32
  }
  func.func @transform_3(%arg0: i32) -> (i32, i32) {
    %c0_i32 = arith.constant 0 : i32
    %c0_i32_0 = arith.constant 0 : i32
    %c0_i32_1 = arith.constant 0 : i32
    return %c0_i32, %c0_i32_0 : i32, i32
  }
  func.func @transform_4(%arg0: i32) -> (i32, i32, i32) {
    %c0_i32 = arith.constant 0 : i32
    %c0_i32_0 = arith.constant 0 : i32
    %c0_i32_1 = arith.constant 0 : i32
    return %arg0, %c0_i32, %c0_i32_0 : i32, i32, i32
  }
}

</mosaic_0001>

<bundles_post_ra>
// kernel: tpu_custom_call.1
= control target key start
LH: loop header
LB: loop body
LE: loop exit
PB: predicated region body
PF: predicated region fallthrough
CT: control target
= control target key end

     0   :  { %9 = vsyncpa [#allocation3], 0  ;;  %s1783_s0 = inlined_call_operand.hbm [shape: f32[2,8,32], index: 0, kind: input, shape index: {}]   ;;  %s1784_s1 = inlined_call_operand.hbm [shape: f32[2,32,32], index: 1, kind: input, shape index: {}]   ;;  %s1785_s2 = inlined_call_operand.hbm [shape: bf16[32,256], index: 2, kind: input, shape index: {}]   ;;  %s1786_s3 = inlined_call_operand.vmem [shape: f32[8,128], index: 3, kind: input, shape index: {}]   ;;  %s1787_s4 = inlined_call_operand.hbm [shape: f32[2,8,32], index: 4, kind: output, shape index: {}]  }
   0x1   :  { %11 = vsyncpa [#allocation3 + $0x1], 0 }
   0x2   :  { %12 = vsyncpa [#allocation6], 0 }
   0x3   :  { %14 = vsyncpa [#allocation6 + $0x1], 0 }
   0x4   :  { %15 = vsyncpa [#allocation4], 0 }
   0x5   :  { %17 = vsyncpa [#allocation4 + $0x1], 0  ;;  %s1413_s15 = smov 0   ;;  %s1415_s16 = smov 0  }
   0x6   :  { %s1417_s17 = smov 0   ;;  %s1419_s18 = smov 0  }
   0x7 LB: > { %s1434_s19 = sadd.s32 4294967295, %s1368_s18   ;;  %s981_s20 = sadd.s32 4294967294, %s1368_s18   ;;  %s1368_s18 = sphi %s1419_s18, %s1811_s18   ;;  %s1364_s17 = sphi %s1417_s17, %s1810_s17   ;;  %s1360_s16 = sphi %s1415_s16, %s1809_s16   ;;  %s1356_s15 = sphi %s1413_s15, %s1808_s15  }
   0x8   : > { %p43_p0 = scmp.ne.s32.totalorder %s1360_s16, %s1356_s15  ;;  %p1788_p1 = scmp.eq.s32.totalorder %s1434_s19, 0 }
   0x9   : > { %p141_p3 = scmp.eq.s32.totalorder %s981_s20, 1  ;;  %p982_p5 = scmp.ge.s32.totalorder %s1368_s18, 1 }
   0xa   : > { %p1443_p4 = por %p1788_p1, %p43_p0  ;;  %p148_p7 = scmp.lt.s32.totalorder %s1368_s18, 3 }
   0xb   : > { %p1448_p6 = por %p141_p3, %p43_p0  ;;  %s1370_s24 = smov [#allocation7]  }
   0xc   : > { %s1793_s21 = scalar_select %p1443_p4, 1, 0 }
   0xd   : > { %s1794_s22 = scalar_select %p1448_p6, 1, 0 }
   0xe   : > { %p1453_p8 = pnand %p982_p5, %p148_p7  ;;  %s160_s25 = sshll.u32 %s1370_s24, 4  ;;  %s1457_s25 = int_to_ptr.vmem [resolvable:$true] %s160_s25 }
   0xf   : > { %s1469_s27 = sadd.s32 1, %s1368_s18   ;;  %s30_s28 = sadd.s32 1, %s1364_s17 }
  0x10   : > { %s1795_s23 = scalar_select %p1453_p8, 1, 0 }
  0x11   : > { %p1112_p9 = pneg %p1453_p8  ;;  %s27_s29 = ssub.s32 %s1368_s18, %s1469_s27 }
  0x12   : > { %s1206_s6 = scalar_lea.hbm %s1785_s2, 512 }
  0x13   : > { %p1464_p11 = pnand %p1112_p9, %p1788_p1  ;;  %p1207_p12 = scmp.ne.s32.totalorder %s1785_s2, %s1206_s6 }
  0x14   : > { %p1213_p5 = scmp.lt.u32.totalorder %s1206_s6, %s1785_s2 }
  0x15   : > { %p1208_p13 = pneg %p1464_p11 }
  0x17   : > { %p1209_p0 = pnand %p1208_p13, %p1207_p12 }
  0x19   : > { %p1210_p3 = pneg %p1209_p0 }
  0x1b   : > { %p1215_p7 = pnand %p1213_p5, %p1210_p3 }
  0x1d   : > { %1218 = shalt.err (!%p1215_p7)
}
  0x1e   : > { %s1219_s11 = scalar_lea.vmem %s1457_s25, 512  ;;  %p1227_p2 = scmp.lt.s32.totalorder %s1457_s25, %s1457_s25 }
  0x1f   : > { %p1220_p9 = scmp.ne.s32.totalorder %s1457_s25, %s1219_s11  ;;  %p1228_p6 = scmp.lt.s32.totalorder %s1219_s11, %s1219_s11 }
  0x21   : > { %p1222_p10 = pnand %p1220_p9, %p1208_p13  ;;  %p1229_p4 = por %p1228_p6, %p1227_p2 }
  0x23   : > { %p1223_p1 = pneg %p1222_p10 }
  0x25   : > { %p1230_p8 = pnand %p1229_p4, %p1223_p1 }
  0x27   : > { %1233 = shalt.err (!%p1230_p8)
}
  0x28   : > { %s1791_s12 = smov 128   ;;  %s1792_s13 = smov 8  }
  0x29   : > { %1115 = dma.hbm_to_vmem [thread:$0]  (!%p1464_p11), %s1785_s2, 512, %s1457_s25, [#allocation6], %s1791_s12, %s1791_s12, %s1792_s13  }
  0x2a   : > { %p28_p1 = scmp.eq.s32.totalorder %s27_s29, 0  ;;  %p37_p2 = scmp.ne.s32.totalorder %s1364_s17, %s1360_s16 }
  0x2b   : > { %p38_p4 = scmp.eq.s32.totalorder %s1368_s18, 0  ;;  %p1128_p6 = scmp.lt.s32.totalorder %s1368_s18, 2 }
  0x2c   : > { %s1503_s24 = scalar_select %p28_p1, %s1364_s17, %s30_s28  }
  0x2d   : > { %p39_p8 = por %p38_p4, %p37_p2  ;;  %p1797_p10 = scmp.eq.s32.totalorder %s1434_s19, 1 }
  0x2e   : > { %s1512_s26 = sand.u32 1, %s1364_s17   ;;  %s986_s5 = sshll.u32 %s1368_s18, 7 }
  0x2f   : > { %p1507_p12 = por %p1797_p10, %p37_p2  ;;  %s985_s6 = sshll.u32 %s1512_s26, 3 }
  0x30   : > { %s1519_s7 = scalar_lea.hbm %s1783_s0, %s986_s5  ;;  %s181_s28 = scalar_lea.vmem [#allocation2], %s985_s6 }
  0x31   : > { %s188_s8 = sshll.u32 %s181_s28, 4  ;;  %p1521_p11 = pnand %p1128_p6, %p39_p8  ;;  %s1525_s8 = int_to_ptr.vmem [resolvable:$true] %s188_s8 }
  0x32   : > { %s987_s10 = sshll.u32 %s1512_s26, 5  ;;  %s178_s11 = scalar_lea.sflag [#allocation3], %s1512_s26 }
  0x33   : > { %s1234_s14 = scalar_lea.hbm %s1519_s7, 128  ;;  %p1236_p0 = pneg %p1521_p11 }
  0x34   : > { %p1235_p13 = scmp.ne.s32.totalorder %s1519_s7, %s1234_s14  ;;  %s1239_s6 = scalar_lea.hbm %s1783_s0, 256 }
  0x35   : > { %p1240_p7 = scmp.lt.u32.totalorder %s1519_s7, %s1783_s0  ;;  %p1241_p9 = scmp.lt.u32.totalorder %s1239_s6, %s1234_s14 }
  0x36   : > { %p1237_p3 = pnand %p1236_p0, %p1235_p13  ;;  %p1243_p2 = scmp.lt.u32.totalorder %s1234_s14, %s1519_s7 }
  0x37   : > { %p1242_p1 = por %p1241_p9, %p1240_p7 }
  0x38   : > { %p1238_p5 = pneg %p1237_p3 }
  0x39   : > { %p1244_p4 = por %p1243_p2, %p1242_p1 }
  0x3b   : > { %p1245_p6 = pnand %p1244_p4, %p1238_p5 }
  0x3d   : > { %1248 = shalt.err (!%p1245_p6)
}
  0x3e   : > { %s1249_s28 = scalar_lea.vmem %s1525_s8, 128  ;;  %s1373_s20 = smov [#allocation2]  }
  0x3f   : > { %p1250_p8 = scmp.ne.s32.totalorder %s1525_s8, %s1249_s28  ;;  %s1254_s5 = sshll.u32 %s1373_s20, 4  ;;  %s1255_s5 = int_to_ptr.vmem [resolvable:$false] %s1254_s5 }
  0x40   : > { %s1256_s25 = scalar_lea.vmem %s1255_s5, 256  ;;  %p1257_p3 = scmp.lt.s32.totalorder %s1525_s8, %s1255_s5 }
  0x41   : > { %p1252_p10 = pnand %p1250_p8, %p1236_p0  ;;  %p1258_p7 = scmp.lt.s32.totalorder %s1256_s25, %s1249_s28 }
  0x43   : > { %p1253_p13 = pneg %p1252_p10  ;;  %p1259_p9 = por %p1258_p7, %p1257_p3 }
  0x45   : > { %p1260_p1 = pnand %p1259_p9, %p1253_p13 }
  0x47   : > { %1263 = shalt.err (!%p1260_p1)
}
  0x48   : > { %1119 = dma.hbm_to_vmem [thread:$0]  (!%p1521_p11), %s1519_s7, 128, %s1525_s8, %s178_s11  }
  0x49   : > { %s199_s14 = scalar_lea.vmem [#allocation5], %s987_s10  ;;  %s195_s29 = sand.u32 1, %s1368_s18  }
  0x4a   : > { %s206_s6 = sshll.u32 %s199_s14, 4  ;;  %s1020_s20 = sshll.u32 %s1368_s18, 9  ;;  %s1557_s6 = int_to_ptr.vmem [resolvable:$true] %s206_s6 }
  0x4b   : > { %s1563_s25 = scalar_lea.hbm %s1784_s1, %s1020_s20  ;;  %s1565_s12 = scalar_lea.sflag [#allocation6], %s195_s29 }
  0x4c   : > { %s1264_s13 = scalar_lea.hbm %s1563_s25, 512  ;;  %s1269_s8 = scalar_lea.hbm %s1784_s1, 1024 }
  0x4d   : > { %p1265_p5 = scmp.ne.s32.totalorder %s1563_s25, %s1264_s13  ;;  %p1270_p6 = scmp.lt.u32.totalorder %s1563_s25, %s1784_s1 }
  0x4e   : > { %p1271_p8 = scmp.lt.u32.totalorder %s1269_s8, %s1264_s13  ;;  %p1273_p13 = scmp.lt.u32.totalorder %s1264_s13, %s1563_s25 }
  0x4f   : > { %p1267_p2 = pnand %p1265_p5, %p1236_p0 }
  0x50   : > { %p1272_p10 = por %p1271_p8, %p1270_p6 }
  0x51   : > { %p1268_p4 = pneg %p1267_p2 }
  0x52   : > { %p1274_p3 = por %p1273_p13, %p1272_p10 }
  0x54   : > { %p1275_p7 = pnand %p1274_p3, %p1268_p4 }
  0x56   : > { %1278 = shalt.err (!%p1275_p7)
}
  0x57   : > { %s1279_s14 = scalar_lea.vmem %s1557_s6, 512  ;;  %s1374_s29 = smov [#allocation5]  }
  0x58   : > { %p1280_p9 = scmp.ne.s32.totalorder %s1557_s6, %s1279_s14  ;;  %s1284_s20 = sshll.u32 %s1374_s29, 4  ;;  %s1285_s20 = int_to_ptr.vmem [resolvable:$false] %s1284_s20 }
  0x59   : > { %s1286_s28 = scalar_lea.vmem %s1285_s20, 1024  ;;  %p1287_p2 = scmp.lt.s32.totalorder %s1557_s6, %s1285_s20 }
  0x5a   : > { %p1282_p1 = pnand %p1280_p9, %p1236_p0  ;;  %p1288_p6 = scmp.lt.s32.totalorder %s1286_s28, %s1279_s14 }
  0x5c   : > { %p1283_p5 = pneg %p1282_p1  ;;  %p1289_p8 = por %p1288_p6, %p1287_p2 }
  0x5e   : > { %p1290_p10 = pnand %p1289_p8, %p1283_p5 }
  0x60   : > { %1293 = shalt.err (!%p1290_p10)
}
  0x61   : > { %s1800_s13 = smov 8   ;;  %s1801_s5 = smov 128  }
  0x62   : > { %1122 = dma.hbm_to_vmem [thread:$0]  (!%p1521_p11), %s1563_s25, 512, %s1557_s6, %s1565_s12, %s1801_s5, %s1801_s5, %s1800_s13  }
  0x63   : > { %p1802_p0 = scmp.ne.s32.totalorder %s1795_s23, 0 }
  0x64   : > { %s1597_s26 = sand.u32 (!%p1802_p0), 1, %s1360_s16   ;;  %p1803_p4 = scmp.ne.s32.totalorder (!%p1802_p0), %s1793_s21, 0 }
  0x65   : > { %218 = sbr.rel (%p1802_p0) target bundleno = 2920 (0xb68), region = 36  ;;  %s991_s7 = sshll.u32 (!%p1802_p0), %s1597_s26, 3 }
  0x66   : > { %s221_s8 = scalar_lea.sflag (!%p1802_p0), [#allocation3], %s1597_s26  ;;  %s224_s9 = scalar_lea.vmem (!%p1802_p0), [#allocation2], %s991_s7 }
  0x6c   : > { %1339 = dma.done.wait (%p1803_p4), %s221_s8, 128  }
  0x6d   : > { %1341 = vsyncadd (%p1803_p4), %s221_s8, 4294967168  ;;  %s229_s23 = sand.u32 1, %s1434_s19   ;;  %s992_s12 = sshll.u32 %s1597_s26, 5 }
  0x6e   : > { %s230_s6 = scalar_lea.sflag [#allocation6], %s229_s23  ;;  %s1609_s25 = scalar_lea.vmem [#allocation5], %s992_s12 }
  0x6f   : > { %1343 = dma.done.wait (%p1803_p4), %s230_s6, 512  }
  0x70   : > { %1345 = vsyncadd (%p1803_p4), %s230_s6, 4294966784  ;;  %p1804_p11 = scmp.eq.s32.totalorder %s1434_s19, 0 }
  0x72   : > { %1347 = dma.done.wait (%p1804_p11), [#allocation6], 512   ;;  %p1805_p13 = pmov %p1804_p11 }
  0x73   : > { %v1375_v0 = vmov 0.0   ;;  %vm1376_vm0 = vmmov 0   ;;  %v1622_v1 = vld [vmem:[#allocation7] ss:$8 sps:$4 sm:$0xff]   ;;  %v1625_v2 = vld [vmem:[#allocation7 + $0x10] ss:$8 sps:$4 sm:$0xff]  }
  0x74   : > { %1349 = vsyncadd (%p1805_p13), [#allocation6], 4294966784  ;;  %1044 = vmatprep.subr.bf16.mxu0 %v1375_v0  ;;  %1048 = vmatprep.mubr.msk.bf16.mxu0 %vm1376_vm0, %v1375_v0  ;;  %v1627_v3 = vld [vmem:[%s224_s9] sm:$0xff]  ;;  %vm291_vm1 = vcmask 261120   ;;  %s1377_s11 = smov 104   ;;  %s1378_s14 = smov 120  }
  0x75   : > { %1045 = vmatpush3.bf16.msra.mxu0 %v1622_v1  ;;  %v269_v4 = vpack.c.bf16 %v1627_v3, %v1627_v3  ;;  %v995_v5 = vld [vmem:[%s1786_s3] ss:$0 sm:$0xff]  ;;  %s1379_s29 = smov 112   ;;  %vm353_vm2 = vcmask 64512   ;;  %s1380_s20 = smov 96   ;;  %v419_v20 = vld [vmem:[%s1609_s25] sm:$0xff] }
  0x76   : > { %1046 = vmatprep.subr.bf16.mxu0 %v1375_v0  ;;  %v420_v22 = vld [vmem:[%s1609_s25 + $0x8] sm:$0xff]  ;;  %v422_v23 = vld [vmem:[%s1609_s25 + $0x18] sm:$0xff]  ;;  %vm423_vm3 = vcmp.lt.f32.partialorder %v419_v20, -0.5  ;;  %v421_v27 = vld [vmem:[%s1609_s25 + $0x10] sm:$0xff]  ;;  %s1381_s28 = smov 64   ;;  %s1382_s13 = smov 32  }
  0x77   : > { %vm424_vm4 = vcmp.lt.f32.partialorder %v420_v22, -0.5  ;;  %vm426_vm5 = vcmp.lt.f32.partialorder %v422_v23, -0.5  ;;  %vm425_vm6 = vcmp.lt.f32.partialorder %v421_v27, -0.5  ;;  %s1383_s5 = smov 16   ;;  %s1384_s8 = smov 8   ;;  %vm551_vm7 = vcmask 130048  }
  0x78   : > { %s1385_s9 = smov 24   ;;  %vm553_vm8 = vcmask 195584   ;;  %s266_s23 = scalar_lea.vmem [#allocation8], %s991_s7 }
  0x79   : > { %1047 = vmatpush3.bf16.msra.mxu0 %v1625_v2  ;;  %s879_s12 = sshll.u32 %s266_s23, 4  ;;  %s866_s10 = scalar_lea.sflag [#allocation4], %s1597_s26  ;;  %s1740_s12 = int_to_ptr.vmem [resolvable:$true] %s879_s12 }
  0x7c   : > { %1049 = vmatmul.mubr.msk.bf16.vlgmr.msra.gmra.mrb[0].mxu0 %vm291_vm1, %v269_v4 }
 0x14f   : > { %v329_v6 = vpop.f32.mrb[0].mxu0 }
 0x150   : > { %v330_v7 = vadd.f32 %v995_v5, %v329_v6  ;;  %v1050_v8 = vpop.f32.mrb[1].mxu0 }
 0x151   : > { %v332_v9 = vpop.f32.mrb[2].mxu0 }
 0x152   : > { %342 = vrot.lane.b32.xlu1 %v330_v7, %s1377_s11  ;;  %336 = vrot.lane.b32.xlu0 %v330_v7, %s1378_s14  ;;  %v1051_v10 = vpop.f32.mrb[3].mxu0  ;;  %s1294_s11 = scalar_lea.vmem %s1740_s12, 128 }
 0x153   : > { %p1295_p3 = scmp.ne.s32.totalorder %s1740_s12, %s1294_s11 }
 0x155   : > { %p1296_p7 = pnand %p1295_p3, %p1507_p12 }
 0x156   : > { %339 = vrot.lane.b32.xlu0 %v330_v7, %s1379_s29 }
 0x157   : > { %p1297_p9 = pneg %p1296_p7 }
 0x1c4   : > { %v337_v11 = vpop.permute.xlu0 %336  ;;  %v343_v13 = vpop.permute.xlu1 %342 }
 0x1c5   : > { %v1637_v12 = vpack.c.bf16 %v337_v11, %v330_v7 }
 0x1c7   : > { %349 = vrot.lane.b32.xlu1 %v1637_v12, %s1380_s20  ;;  %1056 = vmatprep.mubr.msk.bf16.mxu1 %vm353_vm2, %v1637_v12 }
 0x1c8   : > { %v340_v14 = vpop.permute.xlu0 %339 }
 0x1c9   : > { %v1643_v15 = vpack.c.bf16 %v343_v13, %v340_v14 }
 0x1cb   : > { %351 = vrot.lane.b32.xlu0 %v1643_v15, %s1380_s20 }
 0x239   : > { %v350_v16 = vpop.permute.xlu1 %349 }
 0x23a   : > { %1100 = vmatprep.subr.msk.bf16.mxu1 %vm353_vm2, %v350_v16  ;;  %v361_v17 = vsel %vm353_vm2, %v350_v16, 0 }
 0x23b   : > { %1053 = vmatpush3.bf16.xpose.msra.mxu1 %v361_v17 }
 0x23d   : > { %v352_v18 = vpop.permute.xlu0 %351 }
 0x23e   : > { %1101 = vmatprep.subr.msk.bf16.mxu1 %vm353_vm2, %v352_v18  ;;  %v364_v19 = vsel %vm353_vm2, %v352_v18, 0 }
 0x243   : > { %1055 = vmatpush3.bf16.xpose.msra.mxu1 %v364_v19 }
 0x244   : > { %1076 = vmatprep.subr.bf16.mxu1 %v1375_v0 }
 0x24a   : > { %1057 = vmatmul.mubr.msk.bf16.vlgmr.msra.gmra.mrb[0].mxu1 %vm353_vm2, %v1643_v15 }
 0x24b   : > { %1080 = vmatprep.mubr.msk.bf16.mxu1 %vm1376_vm0, %v1375_v0 }
 0x31d   : > { %v1058_v21 = vpop.f32.mrb[0].mxu1 }
 0x31e   : > { %v400_v24 = vpop.f32.mrb[1].mxu1  ;;  %v417_v30 = vmul.f32 0.35355338, %v1058_v21 }
 0x31f   : > { %v415_v25 = vmul.f32 0.35355338, %v400_v24  ;;  %v1059_v26 = vpop.f32.mrb[2].mxu1 }
 0x320   : > { %v418_v28 = vmul.f32 0.35355338, %v1059_v26  ;;  %v403_v29 = vpop.f32.mrb[3].mxu1  ;;  %v429_v37 = vsel %vm425_vm6, %v421_v27, %v417_v30 }
 0x321   : > { %v416_v31 = vmul.f32 0.35355338, %v403_v29  ;;  %v427_v32 = vsel %vm423_vm3, %v419_v20, %v415_v25  ;;  %v437_v39 = vsel %vm291_vm1, %v429_v37, -inf }
 0x322   : > { %v431_v33 = vsel %vm291_vm1, %v427_v32, -inf  ;;  %v430_v35 = vsel %vm426_vm5, %v422_v23, %v418_v28  ;;  %v1004_v28 = vld [vmem:[%s1786_s3 + $0x1] ss:$0 sm:$0xff] }
 0x323   : > { %432 = vmax.xlane.f32.xlu1 %v431_v33  ;;  %v428_v34 = vsel %vm424_vm4, %v420_v22, %v416_v31  ;;  %v440_v38 = vsel %vm291_vm1, %v430_v35, -inf }
 0x324   : > { %v434_v36 = vsel %vm291_vm1, %v428_v34, -inf }
 0x325   : > { %435 = vmax.xlane.f32.xlu0 %v434_v36 }
 0x327   : > { %441 = vmax.xlane.f32.xlu1 %v440_v38 }
 0x329   : > { %438 = vmax.xlane.f32.xlu0 %v437_v39 }
 0x3b0   : > { %v433_v40 = vpop.xlane.xlu1 %432 }
 0x3b1   : > { %v443_v44 = vsub.f32 %v427_v32, %v433_v40  ;;  %v1180_v40 = vld [vmem:[#allocation7 + $0x4] ss:$8 sps:$4 sm:$0xff]  }
 0x3b2   : > { %v436_v41 = vpop.xlane.xlu0 %435  ;;  %1077 = vmatpush3.bf16.msra.mxu1 %v1180_v40 }
 0x3b3   : > { %v444_v42 = vsub.f32 %v428_v34, %v436_v41  ;;  %v447_v50 = vmul.f32 1.442695, %v443_v44  ;;  %1078 = vmatprep.subr.bf16.mxu1 %v1375_v0 }
 0x3b4   : > { %v442_v43 = vpop.xlane.xlu1 %441 }
 0x3b5   : > { %v446_v45 = vsub.f32 %v430_v35, %v442_v43  ;;  %v449_v46 = vmul.f32 1.442695, %v444_v42 }
 0x3b6   : > { %v439_v47 = vpop.xlane.xlu0 %438 }
 0x3b7   : > { %v453_v48 = vmul.f32 1.442695, %v446_v45  ;;  %v445_v49 = vsub.f32 %v429_v37, %v439_v47  ;;  %v1005_v45 = vld [vmem:[%s1786_s3 + $0x2] ss:$0 sm:$0xff]  ;;  %v1006_v47 = vld [vmem:[%s1786_s3 + $0x3] ss:$0 sm:$0xff] }
 0x3b9   : > { %1182 = vpow2.f32 %v453_v48  ;;  %v451_v51 = vmul.f32 1.442695, %v445_v49 }
 0x3ba   : > { %1184 = vpow2.f32 %v449_v46 }
 0x3bb   : > { %1186 = vpow2.f32 %v451_v51 }
 0x3bc   : > { %1188 = vpow2.f32 %v447_v50 }
 0x3c3   : > { %v1183_v52 = vpop.eup %1182 }
 0x3c4   : > { %v1185_v53 = vpop.eup %1184  ;;  %v464_v54 = vsel %vm291_vm1, %v1183_v52, 0.0 }
 0x3c5   : > { %v1187_v55 = vpop.eup %1186  ;;  %465 = vadd.xlane.f32.xlu1 %v464_v54  ;;  %v458_v58 = vsel %vm291_vm1, %v1185_v53, 0.0 }
 0x3c6   : > { %v461_v56 = vsel %vm291_vm1, %v1187_v55, 0.0  ;;  %v1189_v57 = vpop.eup %1188 }
 0x3c7   : > { %462 = vadd.xlane.f32.xlu0 %v461_v56  ;;  %v455_v59 = vsel %vm291_vm1, %v1189_v57, 0.0 }
 0x3c9   : > { %459 = vadd.xlane.f32.xlu1 %v458_v58 }
 0x3cb   : > { %456 = vadd.xlane.f32.xlu0 %v455_v59 }
 0x3da   : > { %479 = vrot.lane.b32.xlu1 %v1643_v15, %s1381_s28 }
 0x3de   : > { %556 = vrot.lane.b32.xlu1 %v1622_v1, %s1382_s13 }
 0x3e1   : > { %477 = vrot.lane.b32.xlu0 %v1637_v12, %s1381_s28 }
 0x452   : > { %v466_v60 = vpop.xlane.xlu1 %465 }
 0x454   : > { %v463_v61 = vpop.xlane.xlu0 %462 }
 0x455   : > { %1190 = vrcp.f32 %v463_v61 }
 0x456   : > { %v460_v62 = vpop.xlane.xlu1 %459 }
 0x457   : > { %1192 = vrcp.f32 %v460_v62 }
 0x458   : > { %1194 = vrcp.f32 %v466_v60  ;;  %v457_v63 = vpop.xlane.xlu0 %456 }
 0x459   : > { %1196 = vrcp.f32 %v457_v63 }
 0x45a   : > { %v480_v5 = vpop.permute.xlu1 %479 }
 0x45c   : > { %v478_v4 = vpop.permute.xlu0 %477 }
 0x45d   : > { %1060 = vmatprep.subr.bf16.mxu0 %v478_v4 }
 0x45e   : > { %1061 = vmatpush3.bf16.msra.mxu0 %v478_v4  ;;  %v557_v15 = vpop.permute.xlu1 %556 }
 0x45f   : > { %1062 = vmatprep.subr.bf16.mxu0 %v480_v5  ;;  %v1191_v6 = vpop.eup %1190 }
 0x460   : > { %v473_v10 = vmul.f32 %v1191_v6, %v1187_v55  ;;  %v1007_v55 = vld [vmem:[%s1786_s3 + $0x4] ss:$0 sm:$0xff] }
 0x461   : > { %v1193_v7 = vpop.eup %1192 }
 0x462   : > { %v1195_v8 = vpop.eup %1194  ;;  %1063 = vmatpush3.bf16.msra.mxu0 %v480_v5  ;;  %v472_v11 = vmul.f32 %v1193_v7, %v1185_v53 }
 0x463   : > { %v1197_v9 = vpop.eup %1196  ;;  %1068 = vmatprep.subr.bf16.mxu0 %v1375_v0  ;;  %v474_v12 = vmul.f32 %v1195_v8, %v1183_v52 }
 0x464   : > { %v471_v1 = vmul.f32 %v1197_v9, %v1189_v57 }
 0x465   : > { %v476_v14 = vpack.c.bf16 %v474_v12, %v473_v10 }
 0x466   : > { %v475_v13 = vpack.c.bf16 %v472_v11, %v471_v1 }
 0x468   : > { %1064 = vmatprep.mubr.msk.bf16.mxu0 %vm291_vm1, %v475_v13 }
 0x469   : > { %1065 = vmatmul.mubr.msk.bf16.vlgmr.msra.gmra.mrb[4].mxu0 %vm291_vm1, %v476_v14 }
 0x46a   : > { %1072 = vmatprep.mubr.msk.bf16.mxu0 %vm1376_vm0, %v1375_v0  ;;  %1069 = vmatpush3.bf16.msra.mxu0 %v557_v15 }
 0x46b   : > { %1070 = vmatprep.subr.bf16.mxu0 %v1375_v0 }
 0x53c   : > { %v1066_v16 = vpop.f32.mrb[4].mxu0 }
 0x53d   : > { %543 = vrot.lane.b32.xlu1 %v1066_v16, %s1383_s5  ;;  %v523_v17 = vpop.f32.mrb[5].mxu0 }
 0x53e   : > { %v1067_v18 = vpop.f32.mrb[6].mxu0 }
 0x53f   : > { %v526_v19 = vpop.f32.mrb[7].mxu0 }
 0x540   : > { %539 = vrot.lane.b32.xlu0 %v526_v19, %s1384_s8  ;;  %v1386_v19 = vmov -1.0  }
 0x541   : > { %558 = vrot.lane.b32.xlu1 %v1625_v2, %s1382_s13 }
 0x544   : > { %547 = vrot.lane.b32.xlu0 %v1067_v18, %s1385_s9  ;;  %s1017_s9 = sshll.u32 %s1434_s19, 7  ;;  %s1387_s19 = smov [#allocation8]  }
 0x545   : > { %s1738_s21 = scalar_lea.hbm %s1787_s4, %s1017_s9  ;;  %s1298_s7 = sshll.u32 %s1387_s19, 4  ;;  %s1299_s7 = int_to_ptr.vmem [resolvable:$false] %s1298_s7 }
 0x546   : > { %s1300_s14 = scalar_lea.vmem %s1299_s7, 256  ;;  %p1301_p1 = scmp.lt.s32.totalorder %s1740_s12, %s1299_s7 }
 0x547   : > { %p1302_p5 = scmp.lt.s32.totalorder %s1300_s14, %s1294_s11 }
 0x549   : > { %p1303_p2 = por %p1302_p5, %p1301_p1 }
 0x54b   : > { %p1304_p6 = pnand %p1303_p2, %p1297_p9 }
 0x5af   : > { %v544_v20 = vpop.permute.xlu1 %543 }
 0x5b2   : > { %v540_v21 = vpop.permute.xlu0 %539 }
 0x5b3   : > { %v550_v22 = vsel %vm353_vm2, %v523_v17, %v540_v21  ;;  %v559_v23 = vpop.permute.xlu1 %558 }
 0x5b4   : > { %1071 = vmatpush3.bf16.msra.mxu0 %v559_v23  ;;  %v552_v24 = vsel %vm551_vm7, %v550_v22, %v544_v20 }
 0x5b5   : > { %1084 = vmatprep.subr.bf16.mxu0 %v1375_v0 }
 0x5b6   : > { %v548_v25 = vpop.permute.xlu0 %547 }
 0x5b7   : > { %v554_v26 = vsel %vm553_vm8, %v552_v24, %v548_v25 }
 0x5b8   : > { %v555_v27 = vpack.c.bf16 %v554_v26, %v554_v26 }
 0x5ba   : > { %1073 = vmatmul.mubr.msk.bf16.vlgmr.msra.gmra.mrb[8].mxu0 %vm291_vm1, %v555_v27 }
 0x5bb   : > { %1088 = vmatprep.mubr.msk.bf16.mxu0 %vm1376_vm0, %v1375_v0 }
 0x68d   : > { %v599_v2 = vpop.f32.mrb[8].mxu0 }
 0x68e   : > { %v605_v29 = vadd.f32 %v599_v2, %v1627_v3  ;;  %v1074_v30 = vpop.f32.mrb[9].mxu0  ;;  %v1181_v3 = vld [vmem:[#allocation7 + $0x14] ss:$8 sps:$4 sm:$0xff]  }
 0x68f   : > { %v602_v31 = vpop.f32.mrb[10].mxu0  ;;  %1079 = vmatpush3.bf16.msra.mxu1 %v1181_v3 }
 0x690   : > { %v1075_v32 = vpop.f32.mrb[11].mxu0  ;;  %v611_v33 = vadd.f32 %v1004_v28, %v605_v29  ;;  %1092 = vmatprep.subr.bf16.mxu1 %v1375_v0 }
 0x692   : > { %v612_v34 = vsel %vm291_vm1, %v611_v33, 0.0 }
 0x693   : > { %613 = vadd.xlane.f32.xlu0 %v612_v34  ;;  %v1013_v34 = vld [vmem:[%s1786_s3 + $0x5] ss:$0 sm:$0xff] }
 0x6a9   : > { %734 = vrot.lane.b32.xlu0 %v1180_v40, %s1382_s13 }
 0x6ad   : > { %736 = vrot.lane.b32.xlu0 %v1181_v3, %s1382_s13 }
 0x720   : > { %v614_v35 = vpop.xlane.xlu0 %613 }
 0x721   : > { %v616_v36 = vmul.f32 0.03125, %v614_v35 }
 0x723   : > { %v617_v37 = vsub.f32 %v611_v33, %v616_v36 }
 0x724   : > { %v735_v53 = vpop.permute.xlu0 %734 }
 0x725   : > { %v618_v38 = vmul.f32 %v617_v37, %v617_v37  ;;  %1085 = vmatpush3.bf16.msra.mxu0 %v735_v53 }
 0x726   : > { %1086 = vmatprep.subr.bf16.mxu0 %v1375_v0 }
 0x727   : > { %v619_v39 = vsel %vm291_vm1, %v618_v38, 0.0 }
 0x728   : > { %620 = vadd.xlane.f32.xlu1 %v619_v39  ;;  %v737_v54 = vpop.permute.xlu0 %736 }
 0x729   : > { %1087 = vmatpush3.bf16.msra.mxu0 %v737_v54 }
 0x739   : > { %783 = vrot.lane.b32.xlu1 %v1180_v40, %s1381_s28 }
 0x73d   : > { %785 = vrot.lane.b32.xlu1 %v1181_v3, %s1381_s28 }
 0x7b5   : > { %v621_v41 = vpop.xlane.xlu1 %620 }
 0x7b6   : > { %v622_v42 = vmul.f32 0.03125, %v621_v41 }
 0x7b8   : > { %v623_v43 = vadd.f32 1e-12, %v622_v42 }
 0x7b9   : > { %v784_v51 = vpop.permute.xlu1 %783 }
 0x7ba   : > { %1198 = vrsqrt.f32 %v623_v43 }
 0x7bd   : > { %v786_v52 = vpop.permute.xlu1 %785 }
 0x7c4   : > { %v1199_v44 = vpop.eup %1198 }
 0x7c5   : > { %v625_v46 = vmul.f32 %v1199_v44, %v617_v37 }
 0x7c7   : > { %v631_v48 = vmul.f32 %v1005_v45, %v625_v46 }
 0x7c9   : > { %v1705_v49 = vadd.f32 %v1006_v47, %v631_v48  ;;  %v1014_v47 = vld [vmem:[%s1786_s3 + $0x6] ss:$0 sm:$0xff] }
 0x7cb   : > { %v642_v50 = vpack.c.bf16 %v1705_v49, %v1705_v49 }
 0x7cd   : > { %1081 = vmatmul.mubr.msk.bf16.vlgmr.msra.gmra.mrb[4].mxu1 %vm291_vm1, %v642_v50 }
 0x7ce   : > { %1096 = vmatprep.mubr.msk.bf16.mxu1 %vm1376_vm0, %v1375_v0  ;;  %1093 = vmatpush3.bf16.msra.mxu1 %v784_v51 }
 0x7cf   : > { %1094 = vmatprep.subr.bf16.mxu1 %v1375_v0 }
 0x7d2   : > { %1095 = vmatpush3.bf16.msra.mxu1 %v786_v52 }
 0x8a0   : > { %v697_v56 = vpop.f32.mrb[4].mxu1 }
 0x8a1   : > { %v698_v57 = vadd.f32 %v1007_v55, %v697_v56  ;;  %v1082_v58 = vpop.f32.mrb[5].mxu1 }
 0x8a2   : > { %v700_v59 = vpop.f32.mrb[6].mxu1 }
 0x8a3   : > { %v704_v60 = vmul.f32 0.70710677, %v698_v57  ;;  %v1083_v61 = vpop.f32.mrb[7].mxu1  ;;  %v703_v22 = vmul.f32 0.5, %v698_v57 }
 0x8a5   : > { %v707_v62 = vand.u32 2147483647, %v704_v60  ;;  %vm705_vm9 = vcmp.ge.f32.partialorder %v704_v60, 0.0 }
 0x8a6   : > { %v706_v20 = vsel %vm705_vm9, 1.0, %v1386_v19 }
 0x8a7   : > { %v708_v63 = vmul.f32 0.3275911, %v707_v62  ;;  %v721_v5 = vsub.f32 0.0, %v707_v62 }
 0x8a9   : > { %v709_v4 = vadd.f32 1.0, %v708_v63  ;;  %v722_v7 = vmul.f32 %v721_v5, %v707_v62 }
 0x8ab   : > { %1200 = vrcp.f32 %v709_v4  ;;  %v723_v9 = vmul.f32 1.442695, %v722_v7 }
 0x8ad   : > { %1202 = vpow2.f32 %v723_v9 }
 0x8b5   : > { %v1201_v6 = vpop.eup %1200 }
 0x8b6   : > { %v712_v0 = vmul.f32 1.0614054, %v1201_v6 }
 0x8b7   : > { %v1203_v16 = vpop.eup %1202 }
 0x8b8   : > { %v713_v8 = vadd.f32 -1.4531521, %v712_v0 }
 0x8ba   : > { %v714_v10 = vmul.f32 %v1201_v6, %v713_v8 }
 0x8bc   : > { %v715_v1 = vadd.f32 1.4214138, %v714_v10 }
 0x8be   : > { %v716_v11 = vmul.f32 %v1201_v6, %v715_v1 }
 0x8c0   : > { %v717_v12 = vadd.f32 -0.28449672, %v716_v11 }
 0x8c2   : > { %v718_v13 = vmul.f32 %v1201_v6, %v717_v12 }
 0x8c4   : > { %v719_v14 = vadd.f32 0.2548296, %v718_v13 }
 0x8c6   : > { %v720_v15 = vmul.f32 %v1201_v6, %v719_v14 }
 0x8c8   : > { %v725_v17 = vmul.f32 %v1203_v16, %v720_v15 }
 0x8ca   : > { %v726_v18 = vsub.f32 1.0, %v725_v17 }
 0x8cc   : > { %v727_v21 = vmul.f32 %v726_v18, %v706_v20 }
 0x8ce   : > { %v728_v23 = vadd.f32 1.0, %v727_v21 }
 0x8d0   : > { %v729_v24 = vmul.f32 %v728_v23, %v703_v22 }
 0x8d2   : > { %v730_v25 = vpack.c.bf16 %v729_v24, %v729_v24 }
 0x8d4   : > { %732 = vrot.lane.b32.xlu0 %v730_v25, %s1380_s20  ;;  %1097 = vmatmul.mubr.msk.bf16.vlgmr.msra.gmra.mrb[8].mxu1 %vm291_vm1, %v730_v25 }
 0x946   : > { %v733_v26 = vpop.permute.xlu0 %732 }
 0x947   : > { %1089 = vmatmul.mubr.msk.bf16.vlgmr.msra.gmra.mrb[12].mxu0 %vm291_vm1, %v733_v26 }
 0x9a7   : > { %v826_v27 = vpop.f32.mrb[8].mxu1 }
 0x9a8   : > { %v1098_v2 = vpop.f32.mrb[9].mxu1 }
 0x9a9   : > { %v829_v28 = vpop.f32.mrb[10].mxu1 }
 0x9aa   : > { %v1099_v29 = vpop.f32.mrb[11].mxu1 }
 0xa1a   : > { %v777_v30 = vpop.f32.mrb[12].mxu0 }
 0xa1b   : > { %v827_v31 = vadd.f32 %v826_v27, %v777_v30  ;;  %v1090_v32 = vpop.f32.mrb[13].mxu0 }
 0xa1c   : > { %v780_v33 = vpop.f32.mrb[14].mxu0 }
 0xa1d   : > { %v832_v35 = vadd.f32 %v827_v31, %v1705_v49  ;;  %v1091_v36 = vpop.f32.mrb[15].mxu0  ;;  %v1015_v49 = vld [vmem:[%s1786_s3 + $0x7] ss:$0 sm:$0xff] }
 0xa1f   : > { %v838_v37 = vadd.f32 %v1013_v34, %v832_v35 }
 0xa21   : > { %v839_v38 = vsel %vm291_vm1, %v838_v37, 0.0 }
 0xa22   : > { %840 = vadd.xlane.f32.xlu1 %v839_v38 }
 0xaaf   : > { %v841_v39 = vpop.xlane.xlu1 %840 }
 0xab0   : > { %v842_v40 = vmul.f32 0.03125, %v841_v39 }
 0xab2   : > { %v843_v3 = vsub.f32 %v838_v37, %v842_v40 }
 0xab4   : > { %v844_v41 = vmul.f32 %v843_v3, %v843_v3 }
 0xab6   : > { %v845_v42 = vsel %vm291_vm1, %v844_v41, 0.0 }
 0xab7   : > { %846 = vadd.xlane.f32.xlu0 %v845_v42 }
 0xb44   : > { %v847_v43 = vpop.xlane.xlu0 %846 }
 0xb45   : > { %v848_v44 = vmul.f32 0.03125, %v847_v43 }
 0xb47   : > { %v849_v45 = vadd.f32 1e-12, %v848_v44 }
 0xb49   : > { %1204 = vrsqrt.f32 %v849_v45 }
 0xb53   : > { %v1205_v46 = vpop.eup %1204 }
 0xb54   : > { %v851_v48 = vmul.f32 %v1205_v46, %v843_v3 }
 0xb56   : > { %v857_v50 = vmul.f32 %v1014_v47, %v851_v48 }
 0xb58   : > { %v863_v51 = vadd.f32 %v1015_v49, %v857_v50 }
 0xb5a   : > { %864 = vst.msk [vmem:[%s266_s23] sm:$0xff] %vm291_vm1, %v863_v51 }
 0xb5b   : > { %1307 = shalt.err (!%p1304_p6)
}
 0xb5c   : > { %s1308_s26 = scalar_lea.hbm %s1738_s21, 128  ;;  %s1312_s20 = scalar_lea.hbm %s1787_s4, 256 }
 0xb5d   : > { %p1309_p8 = scmp.ne.s32.totalorder %s1738_s21, %s1308_s26  ;;  %p1313_p4 = scmp.lt.u32.totalorder %s1738_s21, %s1787_s4 }
 0xb5e   : > { %p1314_p11 = scmp.lt.u32.totalorder %s1312_s20, %s1308_s26  ;;  %p1316_p3 = scmp.lt.u32.totalorder %s1308_s26, %s1738_s21 }
 0xb5f   : > { %p1310_p10 = pnand %p1309_p8, %p1507_p12 }
 0xb60   : > { %p1315_p13 = por %p1314_p11, %p1313_p4 }
 0xb61   : > { %p1311_p0 = pneg %p1310_p10 }
 0xb62   : > { %p1317_p7 = por %p1316_p3, %p1315_p13 }
 0xb64   : > { %p1318_p9 = pnand %p1317_p7, %p1311_p0 }
 0xb66   : > { %1321 = shalt.err (!%p1318_p9)
}
 0xb67   : > { %1110 = dma.vmem_to_hbm [thread:$0]  (%p1507_p12), %s1740_s12, 128, %s1738_s21, %s866_s10  }
 0xb68 PF: > { %s891_s8 = sand.u32 1, %s1356_s15   ;;  %p1806_p1 = scmp.ne.s32.totalorder %s1794_s22, 0 }
 0xb69   : > { %p1807_p5 = scmp.ge.s32.totalorder %s1368_s18, 2  ;;  %s892_s9 = scalar_lea.sflag [#allocation4], %s891_s8 }
 0xb6b   : > { %p1124_p2 = pnand %p1807_p5, %p1806_p1 }
 0xb6d   : > { %1351 = dma.done.wait (!%p1124_p2), %s892_s9, 128  }
 0xb6e   : > { %1353 = vsyncadd (!%p1124_p2), %s892_s9, 4294967168  ;;  %p20_p6 = scmp.ge.s32.totalorder %s1469_s27, 4   ;;  %s1808_s15 = smov %s1360_s16 }
 0xb6f   : > { %s1809_s16 = smov %s1364_s17  ;;  %s1810_s17 = smov %s1503_s24 }
 0xb70   : > { %s1811_s18 = smov %s1469_s27  ;;  %22 = sbr.rel (!%p20_p6) target bundleno = 7 (0x7), region = 98 }
 0xb77   :  { %897 = vsyncpa [#allocation3], 1 }
 0xb78   :  { %899 = vsyncpa [#allocation3 + $0x1], 1 }
 0xb79   :  { %900 = vsyncpa [#allocation6], 1 }
 0xb7a   :  { %902 = vsyncpa [#allocation6 + $0x1], 1 }
 0xb7b   :  { %903 = vsyncpa [#allocation4], 1 }
 0xb7c   :  { %905 = vsyncpa [#allocation4 + $0x1], 1 }

</bundles_post_ra>
